<compile_context>
chip_gen: v7x
topology: tpu7x:2x2x1
jax: 0.10.0
libtpu: 0.0.40
codegen_flags: <defaults>
</compile_context>

<pallas_src>
import functools
import math

import jax
import jax.numpy as jnp
from jax import lax
from jax.experimental import pallas as pl
from jax.experimental.pallas import tpu as pltpu


def _round_up(n, m):
    return ((n + m - 1) // m) * m


def _pcnn_kernel(x_ref, m_ref, cw_ref, cb_ref, dw_ref, db_ref, o_ref, *, num_classes):
    """Per-grid-step (one batch row) fused PCNN forward.

    x_ref:  (1, S, Dp)   embedded+concatenated input, zero-padded in D
    m_ref:  (1, 4, S, 1) [words_mask, piece1, piece2, piece3] as f32 {0,1}
    cw_ref: (3, Dp, Fp)  conv taps, cw_ref[k] == conv_weight[:, :, k].T (zero-padded)
    cb_ref: (1, Fp)      conv bias (zero-padded)
    dw_ref: (3, Fp, Cp)  dense weight split per pooled piece (zero-padded)
    db_ref: (1, Cp)      dense bias (zero-padded)
    o_ref:  (1, 1, Cp)   class probabilities (padded lanes = 0)
    """
    f32 = jnp.float32
    S = x_ref.shape[1]

    # input * words_mask
    wm = m_ref[0, 0]                                   # (S, 1)
    x = x_ref[0] * wm                                  # (S, Dp)

    # Conv1d(kernel=3, padding=1) as three MXU matmuls on +/-1 sublane-shifted copies
    # of x.  The shifts are expressed as one-hot (S, S) matrices so the boundary
    # zero-padding is exact and no unaligned sublane concat/roll is needed.
    ri = lax.broadcasted_iota(jnp.int32, (S, S), 0)
    ci = lax.broadcasted_iota(jnp.int32, (S, S), 1)
    one, zero = f32(1.0), f32(0.0)
    shift_prev = jnp.where(ci == ri - 1, one, zero)    # row s selects x[s-1] (row 0 -> 0)
    shift_next = jnp.where(ci == ri + 1, one, zero)    # row s selects x[s+1] (row S-1 -> 0)
    x_prev = jnp.dot(shift_prev, x, preferred_element_type=f32)
    x_next = jnp.dot(shift_next, x, preferred_element_type=f32)

    conv = (jnp.dot(x_prev, cw_ref[0], preferred_element_type=f32)
            + jnp.dot(x,      cw_ref[1], preferred_element_type=f32)
            + jnp.dot(x_next, cw_ref[2], preferred_element_type=f32)
            + cb_ref[...])                             # (S, Fp)

    neg_inf = f32(-jnp.inf)

    def piece_pool(j):
        pm = m_ref[0, j]                               # (S, 1) piece mask
        masked = jnp.where(pm > 0.5, conv, neg_inf)    # masked_fill where mask == 0
        return jnp.tanh(jnp.max(masked, axis=0, keepdims=True))   # (1, Fp)

    p1 = piece_pool(1)
    p2 = piece_pool(2)
    p3 = piece_pool(3)

    # dense( cat(p1, p2, p3) ) expressed as three 128-aligned matmuls (no concat).
    logits = (jnp.dot(p1, dw_ref[0], preferred_element_type=f32)
              + jnp.dot(p2, dw_ref[1], preferred_element_type=f32)
              + jnp.dot(p3, dw_ref[2], preferred_element_type=f32)
              + db_ref[...])                           # (1, Cp)

    # Softmax over the real classes only; padded lanes forced to -inf -> prob 0.
    col = lax.broadcasted_iota(jnp.int32, logits.shape, 1)
    logits = jnp.where(col < num_classes, logits, neg_inf)
    zmax = jnp.max(logits, axis=-1, keepdims=True)
    e = jnp.exp(logits - zmax)
    denom = jnp.sum(e, axis=-1, keepdims=True)
    # approx=True would put this on the (idle) EUP slot; exact here to keep 1e-5 fidelity.
    probs = e * pl.reciprocal(denom, approx=False)
    o_ref[0] = probs


@jax.jit
def pcnn_forward(params, words_seq, words_mask, arg1_dist_seq, arg2_dist_seq,
                 piece1_mask, piece2_mask, piece3_mask):
    # Embedding lookups + concat (gather stays at the XLA level).
    # TODO(synk): in-kernel embedding gather (manual DMA gather) not implemented.
    word_e = jnp.take(params["word_emb"], words_seq, axis=0)
    d1_e = jnp.take(params["dist1_emb"], arg1_dist_seq, axis=0)
    d2_e = jnp.take(params["dist2_emb"], arg2_dist_seq, axis=0)
    x = jnp.concatenate([word_e, d1_e, d2_e], axis=-1).astype(jnp.float32)   # (B, S, D)
    # NOTE: dropout layers are identity at inference, so they are omitted.

    B, S, D = x.shape
    F = params["conv_b"].shape[0]
    C = params["dense_b"].shape[0]
    Dp = _round_up(D, 128)
    Fp = _round_up(F, 128)
    Cp = _round_up(C, 128)

    # Lane-dense padding of the contraction / feature dims (once, at the boundary).
    x_p = jnp.pad(x, ((0, 0), (0, 0), (0, Dp - D)))

    # All four masks packed into a single compact operand: (B, 4, S, 1).
    masks = jnp.stack(
        [words_mask, piece1_mask, piece2_mask, piece3_mask], axis=1
    ).astype(jnp.float32)[..., None]

    # Conv1d weight (F, D, 3) -> three lane-dense taps (3, Dp, Fp): taps[k] = W[:, :, k].T
    cw = jnp.zeros((3, Dp, Fp), jnp.float32)
    cw = cw.at[:, :D, :F].set(jnp.transpose(params["conv_w"], (2, 1, 0)))
    cb = jnp.zeros((1, Fp), jnp.float32).at[0, :F].set(params["conv_b"])

    # Dense weight (3F, C) -> per-piece blocks (3, Fp, Cp) matching the padded pooled layout.
    dw = jnp.zeros((3, Fp, Cp), jnp.float32)
    dw = dw.at[:, :F, :C].set(params["dense_w"].reshape(3, F, C))
    db = jnp.zeros((1, Cp), jnp.float32).at[0, :C].set(params["dense_b"])

    kernel = functools.partial(_pcnn_kernel, num_classes=C)

    out = pl.pallas_call(
        kernel,
        out_shape=jax.ShapeDtypeStruct((B, 1, Cp), jnp.float32),
        grid=(B,),                                            # one batch row per grid step
        in_specs=[
            pl.BlockSpec((1, S, Dp), lambda b: (b, 0, 0)),        # x: streamed per row
            pl.BlockSpec((1, 4, S, 1), lambda b: (b, 0, 0, 0)),   # packed masks
            pl.BlockSpec((3, Dp, Fp), lambda b: (0, 0, 0)),       # conv taps (resident)
            pl.BlockSpec((1, Fp), lambda b: (0, 0)),              # conv bias
            pl.BlockSpec((3, Fp, Cp), lambda b: (0, 0, 0)),       # dense weight (resident)
            pl.BlockSpec((1, Cp), lambda b: (0, 0)),              # dense bias
        ],
        out_specs=pl.BlockSpec((1, 1, Cp), lambda b: (b, 0, 0)),
        compiler_params=pltpu.CompilerParams(
            dimension_semantics=("parallel",),                # shard batch over TCs (v7x)
            vmem_limit_bytes=32 * 1024 * 1024,
        ),
    )(x_p, masks, cw, cb, dw, db)

    return out[:, 0, :C]


def pcnn_reference(params, words_seq, words_mask, d1_seq, d2_seq, p1, p2, p3):
    """Independent pure-JAX reference (conv via lax.conv_general_dilated)."""
    hi = lax.Precision.HIGHEST
    we = jnp.take(params["word_emb"], words_seq, axis=0)
    e1 = jnp.take(params["dist1_emb"], d1_seq, axis=0)
    e2 = jnp.take(params["dist2_emb"], d2_seq, axis=0)
    x = jnp.concatenate([we, e1, e2], axis=-1)
    x = x * words_mask[:, :, None]
    xt = jnp.transpose(x, (0, 2, 1))                                    # (B, D, S)
    conv = lax.conv_general_dilated(
        xt, params["conv_w"], window_strides=(1,), padding=((1, 1),),
        dimension_numbers=("NCH", "OIH", "NCH"), precision=hi)
    conv = conv + params["conv_b"][None, :, None]                       # (B, F, S)

    def piece(pm):
        masked = jnp.where(pm[:, None, :] > 0.5, conv, -jnp.inf)
        return jnp.tanh(jnp.max(masked, axis=2))                        # (B, F)

    pooled = jnp.concatenate([piece(p1), piece(p2), piece(p3)], axis=1)  # (B, 3F)
    logits = jnp.dot(pooled, params["dense_w"], precision=hi) + params["dense_b"]
    return jax.nn.softmax(logits, axis=-1)


if __name__ == "__main__":
    B, S = 2, 16
    WORD_VOCAB, DIST_VOCAB = 100, 20
    WORD_DIM, DIST_DIM = 32, 8
    NUM_FILTER = 32
    NUM_CLASSES = 7
    D = WORD_DIM + 2 * DIST_DIM   # 48

    key = jax.random.PRNGKey(0)
    ks = jax.random.split(key, 10)

    def uniform(k, shape, scale):
        return jax.random.uniform(k, shape, jnp.float32, -scale, scale)

    # Embedding tables (padding_idx=0 rows zeroed, mirroring nn.Embedding(padding_idx=0)).
    word_emb = uniform(ks[0], (WORD_VOCAB, WORD_DIM), 0.5).at[0].set(0.0)
    dist1_emb = uniform(ks[1], (DIST_VOCAB, DIST_DIM), 0.5).at[0].set(0.0)
    dist2_emb = uniform(ks[2], (DIST_VOCAB, DIST_DIM), 0.5).at[0].set(0.0)

    conv_k = 1.0 / math.sqrt(D * 3)
    conv_w = uniform(ks[3], (NUM_FILTER, D, 3), conv_k)           # torch Conv1d layout (F, D, K)
    conv_b = uniform(ks[4], (NUM_FILTER,), conv_k)
    dense_k = 1.0 / math.sqrt(3 * NUM_FILTER)
    dense_w = uniform(ks[5], (3 * NUM_FILTER, NUM_CLASSES), dense_k)   # == torch Linear weight.T
    dense_b = uniform(ks[6], (NUM_CLASSES,), dense_k)

    params = dict(word_emb=word_emb, dist1_emb=dist1_emb, dist2_emb=dist2_emb,
                  conv_w=conv_w, conv_b=conv_b, dense_w=dense_w, dense_b=dense_b)

    # Token / distance ids and masks (each piece non-empty).
    lengths = jnp.array([14, 11], dtype=jnp.int32)
    pos = jnp.arange(S)[None, :]
    words_mask = (pos < lengths[:, None]).astype(jnp.float32)
    b1 = lengths // 3
    b2 = (2 * lengths) // 3
    p1 = (pos < b1[:, None]).astype(jnp.float32)
    p2 = ((pos >= b1[:, None]) & (pos < b2[:, None])).astype(jnp.float32)
    p3 = ((pos >= b2[:, None]) & (pos < lengths[:, None])).astype(jnp.float32)

    words_seq = jnp.where(words_mask > 0, jax.random.randint(ks[7], (B, S), 1, WORD_VOCAB), 0)
    d1_seq = jnp.where(words_mask > 0, jax.random.randint(ks[8], (B, S), 1, DIST_VOCAB), 0)
    d2_seq = jnp.where(words_mask > 0, jax.random.randint(ks[9], (B, S), 1, DIST_VOCAB), 0)

    out = pcnn_forward(params, words_seq, words_mask, d1_seq, d2_seq, p1, p2, p3)
    out = jax.block_until_ready(out)

    ref = pcnn_reference(params, words_seq, words_mask, d1_seq, d2_seq, p1, p2, p3)
    assert out.shape == (B, NUM_CLASSES)
    assert bool(jnp.all(jnp.isfinite(out)))
    assert bool(jnp.allclose(jnp.sum(out, axis=-1), 1.0, atol=1e-5))
    assert bool(jnp.allclose(out, ref, atol=2e-5, rtol=2e-5)), "mismatch vs reference"

    print("KERNEL_OK")
</pallas_src>

<mosaic_0001>
module attributes {stable_mosaic.version = 11 : i64} {
  func.func @_pcnn_kernel(%arg0: i32, %arg1: memref<1x16x128xf32, #tpu.memory_space<vmem>>, %arg2: memref<1x4x16x1xf32, #tpu.memory_space<vmem>>, %arg3: memref<3x128x128xf32, #tpu.memory_space<vmem>>, %arg4: memref<1x128xf32, #tpu.memory_space<vmem>>, %arg5: memref<3x128x128xf32, #tpu.memory_space<vmem>>, %arg6: memref<1x128xf32, #tpu.memory_space<vmem>>, %arg7: memref<1x1x128xf32, #tpu.memory_space<vmem>>) attributes {dimension_semantics = [#tpu.dimension_semantics<parallel>], iteration_bounds = array<i64: 2>, scalar_prefetch = 0 : i64, scratch_operands = 0 : i64, tpu.core_type = #tpu.core_type<tc>, window_params = [{transform_indices = @transform_0, window_bounds = array<i64: 1, 16, 128>}, {transform_indices = @transform_1, window_bounds = array<i64: 1, 4, 16, 1>}, {pipeline_mode = #tpu.pipeline_mode<synchronous>, transform_indices = @transform_2, window_bounds = array<i64: 3, 128, 128>}, {pipeline_mode = #tpu.pipeline_mode<synchronous>, transform_indices = @transform_3, window_bounds = array<i64: 1, 128>}, {pipeline_mode = #tpu.pipeline_mode<synchronous>, transform_indices = @transform_4, window_bounds = array<i64: 3, 128, 128>}, {pipeline_mode = #tpu.pipeline_mode<synchronous>, transform_indices = @transform_5, window_bounds = array<i64: 1, 128>}, {transform_indices = @transform_6, window_bounds = array<i64: 1, 1, 128>}]} {
    %c0 = arith.constant 0 : index
    %c0_0 = arith.constant 0 : index
    %c0_1 = arith.constant 0 : index
    %c0_2 = arith.constant 0 : index
    %0 = vector.load %arg2[%c0, %c0_0, %c0_1, %c0_2] : memref<1x4x16x1xf32, #tpu.memory_space<vmem>>, vector<1x1x16x1xf32>
    %1 = vector.shape_cast %0 : vector<1x1x16x1xf32> to vector<16x1xf32>
    %c0_3 = arith.constant 0 : index
    %c0_4 = arith.constant 0 : index
    %c0_5 = arith.constant 0 : index
    %2 = vector.load %arg1[%c0_3, %c0_4, %c0_5] : memref<1x16x128xf32, #tpu.memory_space<vmem>>, vector<1x16x128xf32>
    %3 = vector.shape_cast %2 : vector<1x16x128xf32> to vector<16x128xf32>
    %4 = vector.broadcast %1 : vector<16x1xf32> to vector<16x128xf32>
    %5 = arith.mulf %3, %4 : vector<16x128xf32>
    %6 = tpu.iota {dimensions = array<i32: 0>} : vector<16x16xi32>
    %7 = tpu.iota {dimensions = array<i32: 1>} : vector<16x16xi32>
    %c1_i32 = arith.constant 1 : i32
    %8 = vector.broadcast %c1_i32 : i32 to vector<16x16xi32>
    %9 = arith.subi %6, %8 : vector<16x16xi32>
    %10 = arith.cmpi eq, %7, %9 : vector<16x16xi32>
    %cst = arith.constant 1.000000e+00 : f32
    %cst_6 = arith.constant 0.000000e+00 : f32
    %11 = vector.broadcast %cst : f32 to vector<16x16xf32>
    %12 = vector.broadcast %cst_6 : f32 to vector<16x16xf32>
    %13 = arith.select %10, %11, %12 : vector<16x16xi1>, vector<16x16xf32>
    %c1_i32_7 = arith.constant 1 : i32
    %14 = vector.broadcast %c1_i32_7 : i32 to vector<16x16xi32>
    %15 = arith.addi %6, %14 : vector<16x16xi32>
    %16 = arith.cmpi eq, %7, %15 : vector<16x16xi32>
    %cst_8 = arith.constant 1.000000e+00 : f32
    %cst_9 = arith.constant 0.000000e+00 : f32
    %17 = vector.broadcast %cst_8 : f32 to vector<16x16xf32>
    %18 = vector.broadcast %cst_9 : f32 to vector<16x16xf32>
    %19 = arith.select %16, %17, %18 : vector<16x16xi1>, vector<16x16xf32>
    %cst_10 = arith.constant dense<0.000000e+00> : vector<16x128xf32>
    %20 = tpu.matmul %13, %5, %cst_10 {dimension_numbers = #tpu.dot_dimension_numbers<[1], [0], [0], [1], [0, 0, 1, 1], [], []>} : vector<16x16xf32>, vector<16x128xf32>, vector<16x128xf32> -> vector<16x128xf32>
    %cst_11 = arith.constant dense<0.000000e+00> : vector<16x128xf32>
    %21 = tpu.matmul %19, %5, %cst_11 {dimension_numbers = #tpu.dot_dimension_numbers<[1], [0], [0], [1], [0, 0, 1, 1], [], []>} : vector<16x16xf32>, vector<16x128xf32>, vector<16x128xf32> -> vector<16x128xf32>
    %c0_12 = arith.constant 0 : index
    %c0_13 = arith.constant 0 : index
    %c0_14 = arith.constant 0 : index
    %22 = vector.load %arg3[%c0_12, %c0_13, %c0_14] : memref<3x128x128xf32, #tpu.memory_space<vmem>>, vector<1x128x128xf32>
    %23 = vector.shape_cast %22 : vector<1x128x128xf32> to vector<128x128xf32>
    %cst_15 = arith.constant dense<0.000000e+00> : vector<16x128xf32>
    %24 = tpu.matmul %20, %23, %cst_15 {dimension_numbers = #tpu.dot_dimension_numbers<[1], [0], [0], [1], [0, 0, 1, 1], [], []>} : vector<16x128xf32>, vector<128x128xf32>, vector<16x128xf32> -> vector<16x128xf32>
    %c1 = arith.constant 1 : index
    %c0_16 = arith.constant 0 : index
    %c0_17 = arith.constant 0 : index
    %25 = vector.load %arg3[%c1, %c0_16, %c0_17] : memref<3x128x128xf32, #tpu.memory_space<vmem>>, vector<1x128x128xf32>
    %26 = vector.shape_cast %25 : vector<1x128x128xf32> to vector<128x128xf32>
    %cst_18 = arith.constant dense<0.000000e+00> : vector<16x128xf32>
    %27 = tpu.matmul %5, %26, %cst_18 {dimension_numbers = #tpu.dot_dimension_numbers<[1], [0], [0], [1], [0, 0, 1, 1], [], []>} : vector<16x128xf32>, vector<128x128xf32>, vector<16x128xf32> -> vector<16x128xf32>
    %28 = arith.addf %24, %27 : vector<16x128xf32>
    %c2 = arith.constant 2 : index
    %c0_19 = arith.constant 0 : index
    %c0_20 = arith.constant 0 : index
    %29 = vector.load %arg3[%c2, %c0_19, %c0_20] : memref<3x128x128xf32, #tpu.memory_space<vmem>>, vector<1x128x128xf32>
    %30 = vector.shape_cast %29 : vector<1x128x128xf32> to vector<128x128xf32>
    %cst_21 = arith.constant dense<0.000000e+00> : vector<16x128xf32>
    %31 = tpu.matmul %21, %30, %cst_21 {dimension_numbers = #tpu.dot_dimension_numbers<[1], [0], [0], [1], [0, 0, 1, 1], [], []>} : vector<16x128xf32>, vector<128x128xf32>, vector<16x128xf32> -> vector<16x128xf32>
    %32 = arith.addf %28, %31 : vector<16x128xf32>
    %c0_22 = arith.constant 0 : index
    %c0_23 = arith.constant 0 : index
    %33 = vector.load %arg4[%c0_22, %c0_23] : memref<1x128xf32, #tpu.memory_space<vmem>>, vector<1x128xf32>
    %34 = vector.broadcast %33 : vector<1x128xf32> to vector<16x128xf32>
    %35 = arith.addf %32, %34 : vector<16x128xf32>
    %c0_24 = arith.constant 0 : index
    %c1_25 = arith.constant 1 : index
    %c0_26 = arith.constant 0 : index
    %c0_27 = arith.constant 0 : index
    %36 = vector.load %arg2[%c0_24, %c1_25, %c0_26, %c0_27] : memref<1x4x16x1xf32, #tpu.memory_space<vmem>>, vector<1x1x16x1xf32>
    %37 = vector.shape_cast %36 : vector<1x1x16x1xf32> to vector<16x1xf32>
    %cst_28 = arith.constant 5.000000e-01 : f32
    %38 = vector.broadcast %cst_28 : f32 to vector<16x1xf32>
    %39 = arith.cmpf ogt, %37, %38 : vector<16x1xf32>
    %cst_29 = arith.constant 0xFF800000 : f32
    %40 = vector.shape_cast %39 : vector<16x1xi1> to vector<16x1xi1>
    %41 = vector.broadcast %40 : vector<16x1xi1> to vector<16x128xi1>
    %42 = vector.broadcast %cst_29 : f32 to vector<16x128xf32>
    %43 = arith.select %41, %35, %42 : vector<16x128xi1>, vector<16x128xf32>
    %cst_30 = arith.constant dense<0xFF800000> : vector<128xf32>
    %44 = vector.multi_reduction <maximumf>, %43, %cst_30 [0] : vector<16x128xf32> to vector<128xf32>
    %45 = vector.shape_cast %44 : vector<128xf32> to vector<1x128xf32>
    %46 = math.tanh %45 : vector<1x128xf32>
    %c0_31 = arith.constant 0 : index
    %c2_32 = arith.constant 2 : index
    %c0_33 = arith.constant 0 : index
    %c0_34 = arith.constant 0 : index
    %47 = vector.load %arg2[%c0_31, %c2_32, %c0_33, %c0_34] : memref<1x4x16x1xf32, #tpu.memory_space<vmem>>, vector<1x1x16x1xf32>
    %48 = vector.shape_cast %47 : vector<1x1x16x1xf32> to vector<16x1xf32>
    %cst_35 = arith.constant 5.000000e-01 : f32
    %49 = vector.broadcast %cst_35 : f32 to vector<16x1xf32>
    %50 = arith.cmpf ogt, %48, %49 : vector<16x1xf32>
    %cst_36 = arith.constant 0xFF800000 : f32
    %51 = vector.shape_cast %50 : vector<16x1xi1> to vector<16x1xi1>
    %52 = vector.broadcast %51 : vector<16x1xi1> to vector<16x128xi1>
    %53 = vector.broadcast %cst_36 : f32 to vector<16x128xf32>
    %54 = arith.select %52, %35, %53 : vector<16x128xi1>, vector<16x128xf32>
    %cst_37 = arith.constant dense<0xFF800000> : vector<128xf32>
    %55 = vector.multi_reduction <maximumf>, %54, %cst_37 [0] : vector<16x128xf32> to vector<128xf32>
    %56 = vector.shape_cast %55 : vector<128xf32> to vector<1x128xf32>
    %57 = math.tanh %56 : vector<1x128xf32>
    %c0_38 = arith.constant 0 : index
    %c3 = arith.constant 3 : index
    %c0_39 = arith.constant 0 : index
    %c0_40 = arith.constant 0 : index
    %58 = vector.load %arg2[%c0_38, %c3, %c0_39, %c0_40] : memref<1x4x16x1xf32, #tpu.memory_space<vmem>>, vector<1x1x16x1xf32>
    %59 = vector.shape_cast %58 : vector<1x1x16x1xf32> to vector<16x1xf32>
    %cst_41 = arith.constant 5.000000e-01 : f32
    %60 = vector.broadcast %cst_41 : f32 to vector<16x1xf32>
    %61 = arith.cmpf ogt, %59, %60 : vector<16x1xf32>
    %cst_42 = arith.constant 0xFF800000 : f32
    %62 = vector.shape_cast %61 : vector<16x1xi1> to vector<16x1xi1>
    %63 = vector.broadcast %62 : vector<16x1xi1> to vector<16x128xi1>
    %64 = vector.broadcast %cst_42 : f32 to vector<16x128xf32>
    %65 = arith.select %63, %35, %64 : vector<16x128xi1>, vector<16x128xf32>
    %cst_43 = arith.constant dense<0xFF800000> : vector<128xf32>
    %66 = vector.multi_reduction <maximumf>, %65, %cst_43 [0] : vector<16x128xf32> to vector<128xf32>
    %67 = vector.shape_cast %66 : vector<128xf32> to vector<1x128xf32>
    %68 = math.tanh %67 : vector<1x128xf32>
    %c0_44 = arith.constant 0 : index
    %c0_45 = arith.constant 0 : index
    %c0_46 = arith.constant 0 : index
    %69 = vector.load %arg5[%c0_44, %c0_45, %c0_46] : memref<3x128x128xf32, #tpu.memory_space<vmem>>, vector<1x128x128xf32>
    %70 = vector.shape_cast %69 : vector<1x128x128xf32> to vector<128x128xf32>
    %cst_47 = arith.constant dense<0.000000e+00> : vector<1x128xf32>
    %71 = tpu.matmul %46, %70, %cst_47 {dimension_numbers = #tpu.dot_dimension_numbers<[1], [0], [0], [1], [0, 0, 1, 1], [], []>} : vector<1x128xf32>, vector<128x128xf32>, vector<1x128xf32> -> vector<1x128xf32>
    %c1_48 = arith.constant 1 : index
    %c0_49 = arith.constant 0 : index
    %c0_50 = arith.constant 0 : index
    %72 = vector.load %arg5[%c1_48, %c0_49, %c0_50] : memref<3x128x128xf32, #tpu.memory_space<vmem>>, vector<1x128x128xf32>
    %73 = vector.shape_cast %72 : vector<1x128x128xf32> to vector<128x128xf32>
    %cst_51 = arith.constant dense<0.000000e+00> : vector<1x128xf32>
    %74 = tpu.matmul %57, %73, %cst_51 {dimension_numbers = #tpu.dot_dimension_numbers<[1], [0], [0], [1], [0, 0, 1, 1], [], []>} : vector<1x128xf32>, vector<128x128xf32>, vector<1x128xf32> -> vector<1x128xf32>
    %75 = arith.addf %71, %74 : vector<1x128xf32>
    %c2_52 = arith.constant 2 : index
    %c0_53 = arith.constant 0 : index
    %c0_54 = arith.constant 0 : index
    %76 = vector.load %arg5[%c2_52, %c0_53, %c0_54] : memref<3x128x128xf32, #tpu.memory_space<vmem>>, vector<1x128x128xf32>
    %77 = vector.shape_cast %76 : vector<1x128x128xf32> to vector<128x128xf32>
    %cst_55 = arith.constant dense<0.000000e+00> : vector<1x128xf32>
    %78 = tpu.matmul %68, %77, %cst_55 {dimension_numbers = #tpu.dot_dimension_numbers<[1], [0], [0], [1], [0, 0, 1, 1], [], []>} : vector<1x128xf32>, vector<128x128xf32>, vector<1x128xf32> -> vector<1x128xf32>
    %79 = arith.addf %75, %78 : vector<1x128xf32>
    %c0_56 = arith.constant 0 : index
    %c0_57 = arith.constant 0 : index
    %80 = vector.load %arg6[%c0_56, %c0_57] : memref<1x128xf32, #tpu.memory_space<vmem>>, vector<1x128xf32>
    %81 = arith.addf %79, %80 : vector<1x128xf32>
    %82 = tpu.iota {dimensions = array<i32: 1>} : vector<1x128xi32>
    %c7_i32 = arith.constant 7 : i32
    %83 = vector.broadcast %c7_i32 : i32 to vector<1x128xi32>
    %84 = arith.cmpi slt, %82, %83 : vector<1x128xi32>
    %cst_58 = arith.constant 0xFF800000 : f32
    %85 = vector.broadcast %cst_58 : f32 to vector<1x128xf32>
    %86 = arith.select %84, %81, %85 : vector<1x128xi1>, vector<1x128xf32>
    %cst_59 = arith.constant dense<0xFF800000> : vector<1xf32>
    %87 = vector.multi_reduction <maximumf>, %86, %cst_59 [1] : vector<1x128xf32> to vector<1xf32>
    %88 = vector.shape_cast %87 : vector<1xf32> to vector<1x1xf32>
    %89 = vector.broadcast %88 : vector<1x1xf32> to vector<1x128xf32>
    %90 = arith.subf %86, %89 : vector<1x128xf32>
    %91 = math.exp %90 : vector<1x128xf32>
    %cst_60 = arith.constant dense<0.000000e+00> : vector<1xf32>
    %92 = vector.multi_reduction <add>, %91, %cst_60 [1] : vector<1x128xf32> to vector<1xf32>
    %93 = vector.shape_cast %92 : vector<1xf32> to vector<1x1xf32>
    %94 = tpu.reciprocal %93 : vector<1x1xf32> -> vector<1x1xf32>
    %95 = vector.broadcast %94 : vector<1x1xf32> to vector<1x128xf32>
    %96 = arith.mulf %91, %95 : vector<1x128xf32>
    %c0_61 = arith.constant 0 : index
    %c0_62 = arith.constant 0 : index
    %c0_63 = arith.constant 0 : index
    %97 = vector.load %arg7[%c0_61, %c0_62, %c0_63] : memref<1x1x128xf32, #tpu.memory_space<vmem>>, vector<1x1x128xf32>
    %98 = vector.shape_cast %97 : vector<1x1x128xf32> to vector<1x128xf32>
    %99 = vector.shape_cast %96 : vector<1x128xf32> to vector<1x1x128xf32>
    tpu.vector_store %arg7[%c0_61, %c0_62, %c0_63], %99 {strides = array<i32>} : memref<1x1x128xf32, #tpu.memory_space<vmem>>, vector<1x1x128xf32>,
    return
  }
  func.func @transform_0(%arg0: i32) -> (i32, i32, i32) {
    %c0_i32 = arith.constant 0 : i32
    %c0_i32_0 = arith.constant 0 : i32
    %c0_i32_1 = arith.constant 0 : i32
    return %arg0, %c0_i32, %c0_i32_0 : i32, i32, i32
  }
  func.func @transform_1(%arg0: i32) -> (i32, i32, i32, i32) {
    %c0_i32 = arith.constant 0 : i32
    %c0_i32_0 = arith.constant 0 : i32
    %c0_i32_1 = arith.constant 0 : i32
    %c0_i32_2 = arith.constant 0 : i32
    return %arg0, %c0_i32, %c0_i32_0, %c0_i32_1 : i32, i32, i32, i32
  }
  func.func @transform_2(%arg0: i32) -> (i32, i32, i32) {
    %c0_i32 = arith.constant 0 : i32
    %c0_i32_0 = arith.constant 0 : i32
    %c0_i32_1 = arith.constant 0 : i32
    %c0_i32_2 = arith.constant 0 : i32
    return %c0_i32, %c0_i32_0, %c0_i32_1 : i32, i32, i32
  }
  func.func @transform_3(%arg0: i32) -> (i32, i32) {
    %c0_i32 = arith.constant 0 : i32
    %c0_i32_0 = arith.constant 0 : i32
    %c0_i32_1 = arith.constant 0 : i32
    return %c0_i32, %c0_i32_0 : i32, i32
  }
  func.func @transform_4(%arg0: i32) -> (i32, i32, i32) {
    %c0_i32 = arith.constant 0 : i32
    %c0_i32_0 = arith.constant 0 : i32
    %c0_i32_1 = arith.constant 0 : i32
    %c0_i32_2 = arith.constant 0 : i32
    return %c0_i32, %c0_i32_0, %c0_i32_1 : i32, i32, i32
  }
  func.func @transform_5(%arg0: i32) -> (i32, i32) {
    %c0_i32 = arith.constant 0 : i32
    %c0_i32_0 = arith.constant 0 : i32
    %c0_i32_1 = arith.constant 0 : i32
    return %c0_i32, %c0_i32_0 : i32, i32
  }
  func.func @transform_6(%arg0: i32) -> (i32, i32, i32) {
    %c0_i32 = arith.constant 0 : i32
    %c0_i32_0 = arith.constant 0 : i32
    %c0_i32_1 = arith.constant 0 : i32
    return %arg0, %c0_i32, %c0_i32_0 : i32, i32, i32
  }
}

</mosaic_0001>

<bundles_post_ra>
// kernel: pcnn_forward.1
= control target key start
LH: loop header
LB: loop body
LE: loop exit
PB: predicated region body
PF: predicated region fallthrough
CT: control target
= control target key end

     0   :  { %11 = vsyncpa [#allocation3], 0  ;;  %s2418_s0 = inlined_call_operand.vmem [shape: f32[2,16,128], index: 0, kind: input, shape index: {}]   ;;  %s2419_s1 = inlined_call_operand.vmem [shape: f32[2,4,16,1], index: 1, kind: input, shape index: {}]   ;;  %s2420_s2 = inlined_call_operand.vmem [shape: f32[3,128,128], index: 2, kind: input, shape index: {}]   ;;  %s2421_s3 = inlined_call_operand.vmem [shape: f32[1,128], index: 3, kind: input, shape index: {}]   ;;  %s2422_s4 = inlined_call_operand.vmem [shape: f32[3,128,128], index: 4, kind: input, shape index: {}]   ;;  %s2423_s5 = inlined_call_operand.vmem [shape: f32[1,128], index: 5, kind: input, shape index: {}]   ;;  %s2424_s6 = inlined_call_operand.hbm [shape: f32[2,1,128], index: 6, kind: output, shape index: {}]  }
   0x1   :  { %13 = vsyncpa [#allocation3 + $0x1], 0  ;;  %s1950_s21 = smov 0   ;;  %s1952_s22 = smov 0  }
   0x2   :  { %s1954_s23 = smov 0   ;;  %s1956_s24 = smov 0  }
   0x3 LB: > { %s1971_s25 = sadd.s32 4294967295, %s1908_s24   ;;  %s1184_s26 = sadd.s32 4294967294, %s1908_s24   ;;  %s1908_s24 = sphi %s1956_s24, %s2430_s24   ;;  %s1904_s23 = sphi %s1954_s23, %s2429_s23   ;;  %s1900_s22 = sphi %s1952_s22, %s2428_s22   ;;  %s1896_s21 = sphi %s1950_s21, %s2427_s21  }
   0x4   : > { %s1975_s27 = sadd.s32 1, %s1908_s24   ;;  %s162_s28 = sadd.s32 1, %s1904_s23 }
   0x5   : > { %s159_s29 = ssub.s32 %s1908_s24, %s1975_s27  ;;  %p172_p0 = scmp.ne.s32.totalorder %s1904_s23, %s1900_s22 }
   0x6   : > { %p160_p1 = scmp.eq.s32.totalorder %s159_s29, 0  ;;  %p173_p2 = scmp.eq.s32.totalorder %s1971_s25, 1 }
   0x7   : > { %p178_p3 = scmp.ne.s32.totalorder %s1900_s22, %s1896_s21  ;;  %p179_p4 = scmp.eq.s32.totalorder %s1184_s26, 1 }
   0x8   : > { %s1986_s30 = scalar_select %p160_p1, %s1904_s23, %s162_s28  }
   0x9   : > { %p1988_p5 = por %p173_p2, %p172_p0  ;;  %p1992_p6 = por %p179_p4, %p178_p3 }
   0xa   : > { %p1187_p7 = scmp.ge.s32.totalorder %s1908_s24, 1  ;;  %p225_p8 = scmp.lt.s32.totalorder %s1908_s24, 3 }
   0xc   : > { %p226_p9 = pnand %p1187_p7, %p225_p8 }
   0xd   : > { %p259_p10 = scmp.lt.s32.totalorder (!%p226_p9), %s1971_s25, 1  ;;  %v1910_v0 = vmov (!%p226_p9), 0   ;;  %v285_v4 = vlaneseq (!%p226_p9)  ;;  %vm302_vm3 = vcmask (!%p226_p9), 130048   ;;  %v1911_v11 = vmov (!%p226_p9), 0.0   ;;  %v1198_v22 = vld [vmem:[%s2420_s2 + $0x80] sm:$0xff] (!%p226_p9)  ;;  %v1199_v23 = vld [vmem:[%s2420_s2 + $0x88] sm:$0xff] (!%p226_p9) }
   0xe   : > { %229 = sbr.rel (%p226_p9) target bundleno = 1262 (0x4ee), region = 44  ;;  %1834 = vset.pattern.permute.xlu0 (!%p226_p9), %v1910_v0  ;;  %1835 = vset.pattern.permute.xlu1 (!%p226_p9), %v1910_v0  ;;  %v1619_v27 = vpack.c.bf16 (!%p226_p9), %v1199_v23, %v1198_v22  ;;  %v1200_v28 = vld [vmem:[%s2420_s2 + $0x90] sm:$0xff] (!%p226_p9)  ;;  %v1201_v29 = vld [vmem:[%s2420_s2 + $0x98] sm:$0xff] (!%p226_p9)  ;;  %v1202_v33 = vld [vmem:[%s2420_s2 + $0xa0] sm:$0xff] (!%p226_p9)  ;;  %vm1913_vm11 = vmmov (!%p226_p9), 0   ;;  %s257_s29 = sand.u32 (!%p226_p9), 1, %s1900_s22  }
   0xf   : > { %v286_v6 = vshrl.u32 (!%p226_p9), %v285_v4, 7  ;;  %v2015_v8 = vand.u32 (!%p226_p9), 127, %v285_v4  ;;  %v1623_v32 = vpack.c.bf16 (!%p226_p9), %v1201_v29, %v1200_v28  ;;  %v1203_v34 = vld [vmem:[%s2420_s2 + $0xa8] sm:$0xff] (!%p226_p9)  ;;  %v1204_v36 = vld [vmem:[%s2420_s2 + $0xb0] sm:$0xff] (!%p226_p9)  ;;  %v1205_v37 = vld [vmem:[%s2420_s2 + $0xb8] sm:$0xff] (!%p226_p9)  ;;  %s1105_s16 = scalar_lea.sflag (!%p226_p9), [#allocation3], %s257_s29 }
  0x10   : > { %v1627_v35 = vpack.c.bf16 (!%p226_p9), %v1203_v34, %v1202_v33  ;;  %v1631_v38 = vpack.c.bf16 (!%p226_p9), %v1205_v37, %v1204_v36  ;;  %v1206_v39 = vld [vmem:[%s2420_s2 + $0xc0] sm:$0xff] (!%p226_p9)  ;;  %v1207_v40 = vld [vmem:[%s2420_s2 + $0xc8] sm:$0xff] (!%p226_p9)  ;;  %v1208_v42 = vld [vmem:[%s2420_s2 + $0xd0] sm:$0xff] (!%p226_p9) }
  0x11   : > { %v1192_v9 = vadd.s32 (!%p226_p9), 4294967295, %v286_v6  ;;  %v296_v13 = vadd.s32 (!%p226_p9), 1, %v286_v6  ;;  %v287_v15 = vadd.s32 (!%p226_p9), 8, %v286_v6  ;;  %v1635_v41 = vpack.c.bf16 (!%p226_p9), %v1207_v40, %v1206_v39  ;;  %v1209_v43 = vld [vmem:[%s2420_s2 + $0xd8] sm:$0xff] (!%p226_p9)  ;;  %v1210_v45 = vld [vmem:[%s2420_s2 + $0xe0] sm:$0xff] (!%p226_p9)  ;;  %v1211_v46 = vld [vmem:[%s2420_s2 + $0xe8] sm:$0xff] (!%p226_p9) }
  0x12   : > { %v1639_v44 = vpack.c.bf16 (!%p226_p9), %v1209_v43, %v1208_v42  ;;  %v1643_v47 = vpack.c.bf16 (!%p226_p9), %v1211_v46, %v1210_v45  ;;  %v1212_v48 = vld [vmem:[%s2420_s2 + $0xf0] sm:$0xff] (!%p226_p9)  ;;  %v1213_v49 = vld [vmem:[%s2420_s2 + $0xf8] sm:$0xff] (!%p226_p9)  ;;  %v465_v51 = vld [vmem:[%s2420_s2] sm:$0xff] (!%p226_p9) }
  0x13   : > { %vm292_vm2 = vcmp.eq.s32.totalorder (!%p226_p9), %v2015_v8, %v1192_v9  ;;  %vm298_vm4 = vcmp.eq.s32.totalorder (!%p226_p9), %v2015_v8, %v296_v13  ;;  %v1193_v19 = vadd.s32 (!%p226_p9), 4294967295, %v287_v15  ;;  %v297_v20 = vadd.s32 (!%p226_p9), 1, %v287_v15  ;;  %v466_v52 = vld [vmem:[%s2420_s2 + $0x8] sm:$0xff] (!%p226_p9)  ;;  %v467_v54 = vld [vmem:[%s2420_s2 + $0x10] sm:$0xff] (!%p226_p9)  ;;  %v468_v55 = vld [vmem:[%s2420_s2 + $0x18] sm:$0xff] (!%p226_p9) }
  0x14   : > { %v294_v12 = vsel (!%p226_p9), %vm292_vm2, 1.0, %v1911_v11  ;;  %v300_v14 = vsel (!%p226_p9), %vm298_vm4, 1.0, %v1911_v11  ;;  %v1647_v50 = vpack.c.bf16 (!%p226_p9), %v1213_v49, %v1212_v48  ;;  %v1651_v53 = vpack.c.bf16 (!%p226_p9), %v466_v52, %v465_v51  ;;  %v469_v57 = vld [vmem:[%s2420_s2 + $0x20] sm:$0xff] (!%p226_p9)  ;;  %v470_v58 = vld [vmem:[%s2420_s2 + $0x28] sm:$0xff] (!%p226_p9)  ;;  %v471_v60 = vld [vmem:[%s2420_s2 + $0x30] sm:$0xff] (!%p226_p9) }
  0x15   : > { %s2002_s9 = scalar_select %p259_p10, %s1971_s25, 1  ;;  %1391 = vmatprep.mubr.msk.f32.mxu0 %vm302_vm3, %v294_v12  ;;  %1398 = vmatprep.mubr.msk.f32.mxu1 %vm302_vm3, %v300_v14  ;;  %vm293_vm5 = vcmp.eq.s32.totalorder %v2015_v8, %v1193_v19  ;;  %vm299_vm6 = vcmp.eq.s32.totalorder %v2015_v8, %v297_v20  ;;  %v1655_v56 = vpack.c.bf16 %v468_v55, %v467_v54  ;;  %v472_v61 = vld [vmem:[%s2420_s2 + $0x38] sm:$0xff]  ;;  %v473_v63 = vld [vmem:[%s2420_s2 + $0x40] sm:$0xff]  ;;  %v1215_v15 = vld [vmem:[%s2420_s2 + $0x108] sm:$0xff]  ;;  %vm1089_vm2 = vcmp.lt.s32.totalorder %v2015_v8, 7 }
  0x16   : > { %v295_v30 = vsel %vm293_vm5, 1.0, %v1911_v11  ;;  %v301_v31 = vsel %vm299_vm6, 1.0, %v1911_v11  ;;  %v1659_v59 = vpack.c.bf16 %v470_v58, %v469_v57  ;;  %v1663_v62 = vpack.c.bf16 %v472_v61, %v471_v60  ;;  %v476_v4 = vld [vmem:[%s2420_s2 + $0x58] sm:$0xff]  ;;  %v477_v6 = vld [vmem:[%s2420_s2 + $0x60] sm:$0xff]  ;;  %v1219_v36 = vld [vmem:[%s2420_s2 + $0x128] sm:$0xff] }
  0x17   : > { %s1273_s10 = sshll.u32 %s2002_s9, 6  ;;  %s1272_s14 = sshll.u32 %s2002_s9, 4  ;;  %v480_v12 = vld [vmem:[%s2420_s2 + $0x78] sm:$0xff]  ;;  %v1214_v14 = vld [vmem:[%s2420_s2 + $0x100] sm:$0xff]  ;;  %v1223_v42 = vld [vmem:[%s2420_s2 + $0x148] sm:$0xff] }
  0x18   : > { %s2008_s13 = scalar_lea.vmem %s2419_s1, %s1273_s10  ;;  %s263_s17 = scalar_lea.vmem %s2418_s0, %s1272_s14  ;;  %v1217_v29 = vld [vmem:[%s2420_s2 + $0x118] sm:$0xff]  ;;  %v1227_v48 = vld [vmem:[%s2420_s2 + $0x168] sm:$0xff] }
  0x19   : > { %v269_v1 = vld [vmem:[%s2008_s13] sm:$0xff]  ;;  %v1231_v2 = vld [vmem:[%s2008_s13 + $0x10] sm:$0xff]  ;;  %v270_v3 = vld [vmem:[%s2008_s13 + $0x8] sm:$0xff]  ;;  %s1269_s9 = sshll.u32 %s1971_s25, 4  ;;  %s258_s10 = scalar_lea.vmem [#allocation2], %s257_s29 }
  0x1a   : > { %275 = vperm.xlu0 %1834, %v269_v1   ;;  %vm754_vm0 = vcmp.gt.f32.partialorder %v1231_v2, 0.5  ;;  %v1235_v5 = vld [vmem:[%s2008_s13 + $0x30] sm:$0xff]  ;;  %v271_v17 = vld [vmem:[%s263_s17] sm:$0xff]  ;;  %v272_v18 = vld [vmem:[%s263_s17 + $0x8] sm:$0xff]  ;;  %s1117_s11 = sshll.u32 %s258_s10, 4  ;;  %s2376_s15 = scalar_lea.hbm %s2424_s6, %s1269_s9  ;;  %s2378_s11 = int_to_ptr.vmem [resolvable:$true] %s1117_s11 }
  0x1b   : > { %v756_v7 = vsel %vm754_vm0, 1, %v1910_v0  ;;  %vm804_vm1 = vcmp.gt.f32.partialorder %v1235_v5, 0.5  ;;  %v474_v1 = vld [vmem:[%s2420_s2 + $0x48] sm:$0xff]  ;;  %v1232_v20 = vld [vmem:[%s2008_s13 + $0x18] sm:$0xff]  ;;  %s1846_s17 = scalar_lea.vmem %s2378_s11, 16  ;;  %s1914_s25 = smov [#allocation2]  }
  0x1c   : > { %v806_v10 = vsel %vm804_vm1, 1, %v1910_v0  ;;  %v1667_v2 = vpack.c.bf16 %v474_v1, %v473_v63  ;;  %vm755_vm9 = vcmp.gt.f32.partialorder %v1232_v20, 0.5  ;;  %v1236_v22 = vld [vmem:[%s2008_s13 + $0x38] sm:$0xff]  ;;  %v1242_v57 = vld [vmem:[%s2422_s4 + $0xa8] sm:$0xff]  ;;  %p1847_p11 = scmp.ne.s32.totalorder %s2378_s11, %s1846_s17  ;;  %s1850_s18 = sshll.u32 %s1914_s25, 4  ;;  %s1851_s18 = int_to_ptr.vmem [resolvable:$false] %s1850_s18 }
  0x1d   : > { %v757_v23 = vsel %vm755_vm9, 1, %v1910_v0  ;;  %vm805_vm10 = vcmp.gt.f32.partialorder %v1236_v22, 0.5  ;;  %v1221_v39 = vld [vmem:[%s2420_s2 + $0x138] sm:$0xff]  ;;  %v1246_v63 = vld [vmem:[%s2422_s4 + $0xc8] sm:$0xff]  ;;  %s1852_s19 = scalar_lea.vmem %s1851_s18, 32  ;;  %p1853_p0 = scmp.lt.s32.totalorder %s2378_s11, %s1851_s18 }
  0x1e   : > { %280 = vperm.xlu0 %1834, %v270_v3   ;;  %v475_v3 = vld [vmem:[%s2420_s2 + $0x50] sm:$0xff]  ;;  %v1225_v45 = vld [vmem:[%s2420_s2 + $0x158] sm:$0xff]  ;;  %p1848_p12 = pnand %p1847_p11, %p1988_p5  ;;  %p1854_p1 = scmp.lt.s32.totalorder %s1852_s19, %s1846_s17 }
  0x1f   : > { %v1671_v5 = vpack.c.bf16 %v476_v4, %v475_v3  ;;  %v1229_v51 = vld [vmem:[%s2420_s2 + $0x178] sm:$0xff] }
  0x20   : > { %v1240_v54 = vld [vmem:[%s2422_s4 + $0x98] sm:$0xff]  ;;  %p1849_p13 = pneg %p1848_p12  ;;  %p1855_p2 = por %p1854_p1, %p1853_p0 }
  0x21   : > { %v1244_v60 = vld [vmem:[%s2422_s4 + $0xb8] sm:$0xff] }
  0x22   : > { %759 = vperm.xlu0 %1834, %v756_v7   ;;  %v478_v7 = vld [vmem:[%s2420_s2 + $0x68] sm:$0xff]  ;;  %v1248_v3 = vld [vmem:[%s2422_s4 + $0xd8] sm:$0xff]  ;;  %p1856_p3 = pnand %p1855_p2, %p1849_p13 }
  0x23   : > { %v1675_v9 = vpack.c.bf16 %v478_v7, %v477_v6  ;;  %v1250_v6 = vld [vmem:[%s2422_s4 + $0xe8] sm:$0xff]  ;;  %v1251_v7 = vld [vmem:[%s2422_s4 + $0xf0] sm:$0xff] }
  0x26   : > { %809 = vperm.xlu0 %1834, %v806_v10   ;;  %v479_v10 = vld [vmem:[%s2420_s2 + $0x70] sm:$0xff] }
  0x27   : > { %v1679_v13 = vpack.c.bf16 %v480_v12, %v479_v10  ;;  %v1252_v10 = vld [vmem:[%s2422_s4 + $0xf8] sm:$0xff] }
  0x28   : > { %v1737_v12 = vpack.c.bf16 %v1252_v10, %v1251_v7  ;;  %v1253_v7 = vld [vmem:[%s2422_s4 + $0x100] sm:$0xff] }
  0x99   : > { %v276_v16 = vpop.permute.xlu0 %275 }
  0x9a   : > { %v283_v24 = vmul.f32 %v276_v16, %v271_v17  ;;  %v1683_v16 = vpack.c.bf16 %v1215_v15, %v1214_v14  ;;  %v1233_v17 = vld [vmem:[%s2008_s13 + $0x20] sm:$0xff] }
  0x9b   : > { %vm779_vm7 = vcmp.gt.f32.partialorder %v1233_v17, 0.5 }
  0x9c   : > { %v781_v19 = vsel %vm779_vm7, 1, %v1910_v0 }
  0x9d   : > { %v281_v21 = vpop.permute.xlu0 %280  ;;  %784 = vperm.xlu1 %1835, %v781_v19  }
  0x9e   : > { %v284_v25 = vmul.f32 %v281_v21, %v272_v18  ;;  %v1234_v18 = vld [vmem:[%s2008_s13 + $0x28] sm:$0xff] }
  0x9f   : > { %vm780_vm8 = vcmp.gt.f32.partialorder %v1234_v18, 0.5  ;;  %v1230_v18 = vld [vmem:[%s2421_s3] ss:$0 sm:$0xff] }
  0xa0   : > { %v1611_v26 = vpack.c.bf16 %v284_v25, %v283_v24  ;;  %v782_v21 = vsel %vm780_vm8, 1, %v1910_v0 }
  0xa1   : > { %787 = vperm.xlu1 %1835, %v782_v21   ;;  %v760_v15 = vpop.permute.xlu0 %759 }
  0xa2   : > { %1612 = vmatprep.subr.bf16.mxu0 %v1611_v26  ;;  %1616 = vmatprep.subr.bf16.mxu1 %v1611_v26  ;;  %vm764_vm12 = vcmp.eq.s32.totalorder %v760_v15, 1 }
  0xa3   : > { %1614 = vmatpush3.bf16.msra.mxu0 %v1611_v26  ;;  %1618 = vmatpush3.bf16.msra.mxu1 %v1611_v26  ;;  %v1237_v26 = vld [vmem:[%s2422_s4 + $0x80] sm:$0xff] }
  0xa4   : > { %1620 = vmatprep.subr.bf16.mxu0 %v1619_v27 }
  0xa5   : > { %762 = vperm.xlu1 %1835, %v757_v23   ;;  %v810_v17 = vpop.permute.xlu0 %809 }
  0xa6   : > { %1392 = vmatmul.mubr.msk.f32.vlgmr.msra.gmra.mrb[0].mxu0 %vm302_vm3, %v295_v30  ;;  %1399 = vmatmul.mubr.msk.f32.vlgmr.msra.gmra.mrb[0].mxu1 %vm302_vm3, %v301_v31  ;;  %vm814_vm13 = vcmp.eq.s32.totalorder %v810_v17, 1  ;;  %vm1091_vm3 = vcmask 1040384  }
  0xa7   : > { %1622 = vmatpush3.bf16.msra.mxu0 %v1619_v27  ;;  %1433 = vmatprep.mubr.f32.mxu0 %v283_v24  ;;  %v807_v24 = vsel %vm805_vm10, 1, %v1910_v0  ;;  %v1238_v27 = vld [vmem:[%s2422_s4 + $0x88] sm:$0xff]  ;;  %v1216_v0 = vld [vmem:[%s2420_s2 + $0x110] sm:$0xff] }
  0xa8   : > { %1624 = vmatprep.subr.bf16.mxu0 %v1623_v32  ;;  %v1716_v28 = vpack.c.bf16 %v1238_v27, %v1237_v26  ;;  %v1687_v33 = vpack.c.bf16 %v1217_v29, %v1216_v0  ;;  %1538 = vmatprep.mubr.msk.f32.mxu1 %vm1913_vm11, %v1911_v11 }
  0xa9   : > { %812 = vperm.xlu1 %1835, %v807_v24  }
  0xab   : > { %1626 = vmatpush3.bf16.msra.mxu0 %v1623_v32 }
  0xac   : > { %1628 = vmatprep.subr.bf16.mxu0 %v1627_v35 }
  0xaf   : > { %1630 = vmatpush3.bf16.msra.mxu0 %v1627_v35  ;;  %v1218_v35 = vld [vmem:[%s2420_s2 + $0x120] sm:$0xff] }
  0xb0   : > { %1632 = vmatprep.subr.bf16.mxu0 %v1631_v38  ;;  %v1691_v37 = vpack.c.bf16 %v1219_v36, %v1218_v35 }
  0xb3   : > { %1634 = vmatpush3.bf16.msra.mxu0 %v1631_v38  ;;  %v1220_v38 = vld [vmem:[%s2420_s2 + $0x130] sm:$0xff] }
  0xb4   : > { %1636 = vmatprep.subr.bf16.mxu0 %v1635_v41  ;;  %v1695_v40 = vpack.c.bf16 %v1221_v39, %v1220_v38  ;;  %v826_v39 = vld [vmem:[%s2422_s4] sm:$0xff] }
  0xb7   : > { %1638 = vmatpush3.bf16.msra.mxu0 %v1635_v41  ;;  %v1222_v41 = vld [vmem:[%s2420_s2 + $0x140] sm:$0xff] }
  0xb8   : > { %1640 = vmatprep.subr.bf16.mxu0 %v1639_v44  ;;  %v1699_v43 = vpack.c.bf16 %v1223_v42, %v1222_v41 }
  0xbb   : > { %1642 = vmatpush3.bf16.msra.mxu0 %v1639_v44  ;;  %v1224_v44 = vld [vmem:[%s2420_s2 + $0x150] sm:$0xff] }
  0xbc   : > { %1644 = vmatprep.subr.bf16.mxu0 %v1643_v47  ;;  %v1703_v46 = vpack.c.bf16 %v1225_v45, %v1224_v44  ;;  %v829_v44 = vld [vmem:[%s2422_s4 + $0x18] sm:$0xff] }
  0xbf   : > { %1646 = vmatpush3.bf16.msra.mxu0 %v1643_v47  ;;  %v1226_v47 = vld [vmem:[%s2420_s2 + $0x160] sm:$0xff] }
  0xc0   : > { %1648 = vmatprep.subr.bf16.mxu0 %v1647_v50  ;;  %v1707_v49 = vpack.c.bf16 %v1227_v48, %v1226_v47  ;;  %v830_v48 = vld [vmem:[%s2422_s4 + $0x20] sm:$0xff] }
  0xc3   : > { %1650 = vmatpush3.bf16.msra.mxu0 %v1647_v50  ;;  %v1228_v50 = vld [vmem:[%s2420_s2 + $0x170] sm:$0xff] }
  0xc4   : > { %1652 = vmatprep.subr.bf16.mxu0 %v1651_v53  ;;  %v1711_v52 = vpack.c.bf16 %v1229_v51, %v1228_v50 }
  0xc6   : > { %1434 = vmatmul.mubr.f32.vlgmr.msra.gmra.mrb[2].mxu0 %v284_v25  ;;  %v1912_v25 = vmov 0.0|0.0  }
  0xc7   : > { %1654 = vmatpush3.bf16.msra.mxu0 %v1651_v53  ;;  %1715 = vmatprep.subr.bf16.mxu1 %v1912_v25  ;;  %v1239_v53 = vld [vmem:[%s2422_s4 + $0x90] sm:$0xff] }
  0xc8   : > { %1656 = vmatprep.subr.bf16.mxu0 %v1655_v56  ;;  %1717 = vmatpush3.bf16.msra.mxu1 %v1716_v28  ;;  %v1719_v55 = vpack.c.bf16 %v1240_v54, %v1239_v53  ;;  %v833_v53 = vld [vmem:[%s2422_s4 + $0x38] sm:$0xff] }
  0xc9   : > { %1718 = vmatprep.subr.bf16.mxu1 %v1912_v25 }
  0xcb   : > { %1658 = vmatpush3.bf16.msra.mxu0 %v1655_v56  ;;  %v1241_v56 = vld [vmem:[%s2422_s4 + $0xa0] sm:$0xff] }
  0xcc   : > { %1660 = vmatprep.subr.bf16.mxu0 %v1659_v59  ;;  %1720 = vmatpush3.bf16.msra.mxu1 %v1719_v55  ;;  %v1722_v58 = vpack.c.bf16 %v1242_v57, %v1241_v56  ;;  %v834_v56 = vld [vmem:[%s2422_s4 + $0x40] sm:$0xff]  ;;  %v835_v57 = vld [vmem:[%s2422_s4 + $0x48] sm:$0xff] }
  0xcd   : > { %1721 = vmatprep.subr.bf16.mxu1 %v1912_v25 }
  0xcf   : > { %1662 = vmatpush3.bf16.msra.mxu0 %v1659_v59  ;;  %v1243_v59 = vld [vmem:[%s2422_s4 + $0xb0] sm:$0xff] }
  0xd0   : > { %1664 = vmatprep.subr.bf16.mxu0 %v1663_v62  ;;  %1723 = vmatpush3.bf16.msra.mxu1 %v1722_v58  ;;  %v1725_v61 = vpack.c.bf16 %v1244_v60, %v1243_v59  ;;  %v1752_v59 = vpack.c.bf16 %v835_v57, %v834_v56  ;;  %v836_v60 = vld [vmem:[%s2422_s4 + $0x50] sm:$0xff] }
  0xd1   : > { %1724 = vmatprep.subr.bf16.mxu1 %v1912_v25 }
  0xd3   : > { %1666 = vmatpush3.bf16.msra.mxu0 %v1663_v62  ;;  %v1245_v62 = vld [vmem:[%s2422_s4 + $0xc0] sm:$0xff] }
  0xd4   : > { %1668 = vmatprep.subr.bf16.mxu0 %v1667_v2  ;;  %1726 = vmatpush3.bf16.msra.mxu1 %v1725_v61  ;;  %v1728_v1 = vpack.c.bf16 %v1246_v63, %v1245_v62  ;;  %v837_v61 = vld [vmem:[%s2422_s4 + $0x58] sm:$0xff] }
  0xd5   : > { %1727 = vmatprep.subr.bf16.mxu1 %v1912_v25  ;;  %v1755_v63 = vpack.c.bf16 %v837_v61, %v836_v60 }
  0xd7   : > { %1670 = vmatpush3.bf16.msra.mxu0 %v1667_v2  ;;  %v1247_v2 = vld [vmem:[%s2422_s4 + $0xd0] sm:$0xff] }
  0xd8   : > { %1672 = vmatprep.subr.bf16.mxu0 %v1671_v5  ;;  %1729 = vmatpush3.bf16.msra.mxu1 %v1728_v1  ;;  %v1731_v4 = vpack.c.bf16 %v1248_v3, %v1247_v2  ;;  %v838_v1 = vld [vmem:[%s2422_s4 + $0x60] sm:$0xff]  ;;  %v839_v2 = vld [vmem:[%s2422_s4 + $0x68] sm:$0xff] }
  0xd9   : > { %1730 = vmatprep.subr.bf16.mxu1 %v1912_v25  ;;  %v1758_v3 = vpack.c.bf16 %v839_v2, %v838_v1 }
  0xdb   : > { %1674 = vmatpush3.bf16.msra.mxu0 %v1671_v5  ;;  %v1249_v5 = vld [vmem:[%s2422_s4 + $0xe0] sm:$0xff] }
  0xdc   : > { %1676 = vmatprep.subr.bf16.mxu0 %v1675_v9  ;;  %1732 = vmatpush3.bf16.msra.mxu1 %v1731_v4  ;;  %v840_v4 = vld [vmem:[%s2422_s4 + $0x70] sm:$0xff] }
  0xdd   : > { %1733 = vmatprep.subr.bf16.mxu1 %v1912_v25 }
  0xdf   : > { %1678 = vmatpush3.bf16.msra.mxu0 %v1675_v9  ;;  %v1734_v9 = vpack.c.bf16 %v1250_v6, %v1249_v5  ;;  %v841_v5 = vld [vmem:[%s2422_s4 + $0x78] sm:$0xff] }
  0xe0   : > { %1680 = vmatprep.subr.bf16.mxu0 %v1679_v13  ;;  %v1761_v6 = vpack.c.bf16 %v841_v5, %v840_v4 }
  0xe1   : > { %1735 = vmatpush3.bf16.msra.mxu1 %v1734_v9  ;;  %v1254_v9 = vld [vmem:[%s2422_s4 + $0x108] sm:$0xff] }
  0xe2   : > { %1736 = vmatprep.subr.bf16.mxu1 %v1912_v25 }
  0xe3   : > { %1682 = vmatpush3.bf16.msra.mxu0 %v1679_v13 }
  0xe4   : > { %1684 = vmatprep.subr.bf16.mxu0 %v1683_v16 }
  0xe5   : > { %1738 = vmatpush3.bf16.msra.mxu1 %v1737_v12  ;;  %v1764_v12 = vpack.c.bf16 %v1254_v9, %v1253_v7 }
  0xe6   : > { %1739 = vmatprep.subr.bf16.mxu1 %v1912_v25 }
 0x11c   : > { %v785_v13 = vpop.permute.xlu1 %784 }
 0x11d   : > { %vm789_vm1 = vcmp.eq.s32.totalorder %v785_v13, 1  ;;  %v1255_v13 = vld [vmem:[%s2422_s4 + $0x110] sm:$0xff] }
 0x120   : > { %v788_v14 = vpop.permute.xlu1 %787 }
 0x121   : > { %vm790_vm14 = vcmp.eq.s32.totalorder %v788_v14, 1  ;;  %v1256_v14 = vld [vmem:[%s2422_s4 + $0x118] sm:$0xff] }
 0x122   : > { %v1767_v17 = vpack.c.bf16 %v1256_v14, %v1255_v13 }
 0x179   : > { %v1393_v30 = vpop.f32.mrb[0].mxu0  ;;  %v1400_v31 = vpop.f32.mrb[0].mxu1 }
 0x17a   : > { %v375_v32 = vpop.f32.mrb[1].mxu0  ;;  %v456_v34 = vpop.f32.mrb[1].mxu1 }
 0x17b   : > { %1468 = vmatprep.mubr.f32.mxu0 %v375_v32 }
 0x17c   : > { %1469 = vmatmul.mubr.f32.vlgmr.msra.gmra.mrb[2].mxu0 %v1393_v30 }
 0x17d   : > { %1686 = vmatpush3.bf16.msra.mxu0 %v1683_v16  ;;  %1503 = vmatprep.mubr.f32.mxu0 %v456_v34  ;;  %v763_v16 = vpop.permute.xlu1 %762 }
 0x17e   : > { %1688 = vmatprep.subr.bf16.mxu0 %v1687_v33  ;;  %vm765_vm15 = vcmp.eq.s32.totalorder %v763_v16, 1 }
 0x181   : > { %1690 = vmatpush3.bf16.msra.mxu0 %v1687_v33  ;;  %v813_v19 = vpop.permute.xlu1 %812 }
 0x182   : > { %1692 = vmatprep.subr.bf16.mxu0 %v1691_v37  ;;  %vm815_vm0 = vcmp.eq.s32.totalorder %v813_v19, 1  ;;  %v1258_v19 = vld [vmem:[%s2422_s4 + $0x128] sm:$0xff] }
 0x185   : > { %1694 = vmatpush3.bf16.msra.mxu0 %v1691_v37 }
 0x186   : > { %1696 = vmatprep.subr.bf16.mxu0 %v1695_v40 }
 0x189   : > { %1698 = vmatpush3.bf16.msra.mxu0 %v1695_v40  ;;  %v827_v40 = vld [vmem:[%s2422_s4 + $0x8] sm:$0xff] }
 0x18a   : > { %1700 = vmatprep.subr.bf16.mxu0 %v1699_v43  ;;  %v1740_v42 = vpack.c.bf16 %v827_v40, %v826_v39 }
 0x18d   : > { %1702 = vmatpush3.bf16.msra.mxu0 %v1699_v43  ;;  %v828_v43 = vld [vmem:[%s2422_s4 + $0x10] sm:$0xff] }
 0x18e   : > { %1704 = vmatprep.subr.bf16.mxu0 %v1703_v46  ;;  %v1743_v47 = vpack.c.bf16 %v829_v44, %v828_v43 }
 0x191   : > { %1706 = vmatpush3.bf16.msra.mxu0 %v1703_v46 }
 0x192   : > { %1708 = vmatprep.subr.bf16.mxu0 %v1707_v49 }
 0x195   : > { %1710 = vmatpush3.bf16.msra.mxu0 %v1707_v49  ;;  %v831_v49 = vld [vmem:[%s2422_s4 + $0x28] sm:$0xff] }
 0x196   : > { %1712 = vmatprep.subr.bf16.mxu0 %v1711_v52  ;;  %v1746_v51 = vpack.c.bf16 %v831_v49, %v830_v48 }
 0x199   : > { %1714 = vmatpush3.bf16.msra.mxu0 %v1711_v52  ;;  %v832_v52 = vld [vmem:[%s2422_s4 + $0x30] sm:$0xff] }
 0x19a   : > { %v1749_v55 = vpack.c.bf16 %v833_v53, %v832_v52 }
 0x19c   : > { %1504 = vmatmul.mubr.f32.vlgmr.msra.gmra.mrb[2].mxu0 %v1400_v31 }
 0x26f   : > { %v1505_v20 = vpop.f32.mrb[2].mxu0 }
 0x270   : > { %v750_v21 = vadd.f32 %v1505_v20, %v1230_v18  ;;  %v731_v22 = vpop.f32.mrb[3].mxu0 }
 0x271   : > { %v749_v23 = vadd.f32 %v1230_v18, %v731_v22  ;;  %v1257_v18 = vld [vmem:[%s2422_s4 + $0x120] sm:$0xff]  ;;  %v1259_v22 = vld [vmem:[%s2422_s4 + $0x130] sm:$0xff] }
 0x272   : > { %v767_v24 = vsel %vm765_vm15, %v750_v21, -inf  ;;  %v792_v26 = vsel %vm790_vm14, %v750_v21, -inf  ;;  %v817_v27 = vsel %vm815_vm0, %v750_v21, -inf  ;;  %v1770_v21 = vpack.c.bf16 %v1258_v19, %v1257_v18 }
 0x273   : > { %v766_v28 = vsel %vm764_vm12, %v749_v23, -inf  ;;  %v791_v0 = vsel %vm789_vm1, %v749_v23, -inf  ;;  %v816_v29 = vsel %vm814_vm13, %v749_v23, -inf }
 0x274   : > { %v768_v30 = vmax.f32 %v766_v28, %v767_v24  ;;  %v793_v31 = vmax.f32 %v791_v0, %v792_v26  ;;  %v2248_v32 = vmax.f32 %v816_v29, %v817_v27  ;;  %v1261_v26 = vld [vmem:[%s2422_s4 + $0x140] sm:$0xff]  ;;  %v1262_v27 = vld [vmem:[%s2422_s4 + $0x148] sm:$0xff]  ;;  %v1263_v29 = vld [vmem:[%s2422_s4 + $0x150] sm:$0xff] }
 0x275   : > { %v1776_v0 = vpack.c.bf16 %v1262_v27, %v1261_v26 }
 0x276   : > { %v794_v33 = vrot.slane %v793_v31, 4  ;;  %v769_v41 = vrot.slane %v768_v30, 4  ;;  %v819_v10 = vrot.slane %v2248_v32, 4 }
 0x278   : > { %v795_v34 = vmax.f32 %v793_v31, %v794_v33  ;;  %v770_v46 = vmax.f32 %v768_v30, %v769_v41  ;;  %v820_v16 = vmax.f32 %v2248_v32, %v819_v10  ;;  %v1264_v30 = vld [vmem:[%s2422_s4 + $0x158] sm:$0xff]  ;;  %v1265_v33 = vld [vmem:[%s2422_s4 + $0x160] sm:$0xff] }
 0x279   : > { %v1779_v32 = vpack.c.bf16 %v1264_v30, %v1263_v29 }
 0x27a   : > { %v796_v35 = vrot.slane %v795_v34, 2  ;;  %v771_v50 = vrot.slane %v770_v46, 2  ;;  %v821_v20 = vrot.slane %v820_v16, 2 }
 0x27c   : > { %v797_v36 = vmax.f32 %v795_v34, %v796_v35  ;;  %v772_v54 = vmax.f32 %v770_v46, %v771_v50  ;;  %v822_v23 = vmax.f32 %v820_v16, %v821_v20  ;;  %v1266_v34 = vld [vmem:[%s2422_s4 + $0x168] sm:$0xff]  ;;  %v1087_v46 = vld [vmem:[%s2423_s5] sm:$0x1] }
 0x27d   : > { %v1782_v35 = vpack.c.bf16 %v1266_v34, %v1265_v33 }
 0x27e   : > { %v798_v37 = vrot.slane %v797_v36, 1  ;;  %v773_v58 = vrot.slane %v772_v54, 1  ;;  %v823_v28 = vrot.slane %v822_v23, 1 }
 0x280   : > { %v799_v38 = vmax.f32 %v797_v36, %v798_v37  ;;  %v774_v62 = vmax.f32 %v772_v54, %v773_v58  ;;  %v824_v31 = vmax.f32 %v822_v23, %v823_v28  ;;  %v1267_v36 = vld [vmem:[%s2422_s4 + $0x170] sm:$0xff]  ;;  %v1268_v37 = vld [vmem:[%s2422_s4 + $0x178] sm:$0xff] }
 0x282   : > { %1836 = vtanh.f32 %v799_v38  ;;  %v1785_v38 = vpack.c.bf16 %v1268_v37, %v1267_v36 }
 0x283   : > { %1838 = vtanh.f32 %v774_v62 }
 0x284   : > { %1840 = vtanh.f32 %v824_v31 }
 0x28c   : > { %v1837_v45 = vpop.eup %1836 }
 0x28d   : > { %1539 = vmatmul.mubr.f32.vlgmr.msra.gmra.mrb[2].mxu1 %v1837_v45  ;;  %v1839_v15 = vpop.eup %1838 }
 0x28e   : > { %1741 = vmatpush3.bf16.msra.mxu1 %v1740_v42  ;;  %1573 = vmatprep.mubr.msk.f32.mxu1 %vm1913_vm11, %v1911_v11  ;;  %v1841_v39 = vpop.eup %1840 }
 0x28f   : > { %1742 = vmatprep.subr.bf16.mxu1 %v1912_v25 }
 0x292   : > { %1744 = vmatpush3.bf16.msra.mxu1 %v1743_v47 }
 0x293   : > { %1745 = vmatprep.subr.bf16.mxu1 %v1912_v25 }
 0x296   : > { %1747 = vmatpush3.bf16.msra.mxu1 %v1746_v51 }
 0x297   : > { %1748 = vmatprep.subr.bf16.mxu1 %v1912_v25 }
 0x29a   : > { %1750 = vmatpush3.bf16.msra.mxu1 %v1749_v55 }
 0x29b   : > { %1751 = vmatprep.subr.bf16.mxu1 %v1912_v25 }
 0x29e   : > { %1753 = vmatpush3.bf16.msra.mxu1 %v1752_v59 }
 0x29f   : > { %1754 = vmatprep.subr.bf16.mxu1 %v1912_v25 }
 0x2a2   : > { %1756 = vmatpush3.bf16.msra.mxu1 %v1755_v63 }
 0x2a3   : > { %1757 = vmatprep.subr.bf16.mxu1 %v1912_v25 }
 0x2a6   : > { %1759 = vmatpush3.bf16.msra.mxu1 %v1758_v3 }
 0x2a7   : > { %1760 = vmatprep.subr.bf16.mxu1 %v1912_v25 }
 0x2aa   : > { %1762 = vmatpush3.bf16.msra.mxu1 %v1761_v6 }
 0x2ab   : > { %1763 = vmatprep.subr.bf16.mxu1 %v1912_v25 }
 0x2ad   : > { %1574 = vmatmul.mubr.f32.vlgmr.msra.gmra.mrb[4].mxu1 %v1839_v15 }
 0x2ae   : > { %1765 = vmatpush3.bf16.msra.mxu1 %v1764_v12  ;;  %1608 = vmatprep.mubr.msk.f32.mxu1 %vm1913_vm11, %v1911_v11  ;;  %v1260_v11 = vld [vmem:[%s2422_s4 + $0x138] sm:$0xff] }
 0x2af   : > { %1766 = vmatprep.subr.bf16.mxu1 %v1912_v25  ;;  %v1773_v24 = vpack.c.bf16 %v1260_v11, %v1259_v22 }
 0x2b2   : > { %1768 = vmatpush3.bf16.msra.mxu1 %v1767_v17 }
 0x2b3   : > { %1769 = vmatprep.subr.bf16.mxu1 %v1912_v25 }
 0x2b6   : > { %1771 = vmatpush3.bf16.msra.mxu1 %v1770_v21 }
 0x2b7   : > { %1772 = vmatprep.subr.bf16.mxu1 %v1912_v25 }
 0x2ba   : > { %1774 = vmatpush3.bf16.msra.mxu1 %v1773_v24 }
 0x2bb   : > { %1775 = vmatprep.subr.bf16.mxu1 %v1912_v25 }
 0x2be   : > { %1777 = vmatpush3.bf16.msra.mxu1 %v1776_v0 }
 0x2bf   : > { %1778 = vmatprep.subr.bf16.mxu1 %v1912_v25 }
 0x2c2   : > { %1780 = vmatpush3.bf16.msra.mxu1 %v1779_v32 }
 0x2c3   : > { %1781 = vmatprep.subr.bf16.mxu1 %v1912_v25 }
 0x2c6   : > { %1783 = vmatpush3.bf16.msra.mxu1 %v1782_v35 }
 0x2c7   : > { %1784 = vmatprep.subr.bf16.mxu1 %v1912_v25 }
 0x2ca   : > { %1786 = vmatpush3.bf16.msra.mxu1 %v1785_v38 }
 0x2cd   : > { %1609 = vmatmul.mubr.f32.vlgmr.msra.gmra.mrb[6].mxu1 %v1841_v39 }
 0x360   : > { %v925_v40 = vpop.f32.mrb[2].mxu1 }
 0x361   : > { %v1540_v41 = vpop.f32.mrb[3].mxu1 }
 0x380   : > { %v995_v42 = vpop.f32.mrb[4].mxu1 }
 0x381   : > { %v996_v43 = vadd.f32 %v995_v42, %v925_v40  ;;  %v1575_v44 = vpop.f32.mrb[5].mxu1 }
 0x3a0   : > { %v1082_v45 = vpop.f32.mrb[6].mxu1 }
 0x3a1   : > { %v1086_v47 = vadd.f32 %v1082_v45, %v996_v43  ;;  %v1610_v48 = vpop.f32.mrb[7].mxu1 }
 0x3a3   : > { %v1088_v25 = vadd.f32 %v1087_v46, %v1086_v47 }
 0x3a5   : > { %v1090_v49 = vsel %vm1089_vm2, %v1088_v25, -inf }
 0x3a6   : > { %v1092_v50 = vsel %vm1091_vm3, %v1090_v49, -inf }
 0x3a7   : > { %1093 = vmax.xlane.f32.xlu0 %v1092_v50 }
 0x434   : > { %v1094_v51 = vpop.xlane.xlu0 %1093 }
 0x435   : > { %v1095_v52 = vsub.f32 %v1090_v49, %v1094_v51 }
 0x437   : > { %v1096_v53 = vmul.f32 1.442695, %v1095_v52 }
 0x439   : > { %1842 = vpow2.f32 %v1096_v53 }
 0x443   : > { %v1843_v54 = vpop.eup %1842 }
 0x444   : > { %v1098_v55 = vsel %vm1091_vm3, %v1843_v54, 0.0 }
 0x445   : > { %1099 = vadd.xlane.f32.xlu1 %v1098_v55 }
 0x4d2   : > { %v1100_v56 = vpop.xlane.xlu1 %1099 }
 0x4d3   : > { %1844 = vrcp.f32 %v1100_v56 }
 0x4dd   : > { %v1845_v8 = vpop.eup %1844 }
 0x4de   : > { %v1102_v57 = vmul.f32 %v1845_v8, %v1843_v54 }
 0x4e0   : > { %1103 = vst [vmem:[%s258_s10] sm:$0x1] %v1102_v57 }
 0x4e1   : > { %1859 = shalt.err (!%p1856_p3)
}
 0x4e2   : > { %s1860_s13 = scalar_lea.hbm %s2376_s15, 16  ;;  %s1864_s28 = scalar_lea.hbm %s2424_s6, 32 }
 0x4e3   : > { %p1861_p4 = scmp.ne.s32.totalorder %s2376_s15, %s1860_s13  ;;  %p1865_p9 = scmp.lt.u32.totalorder %s2376_s15, %s2424_s6 }
 0x4e4   : > { %p1866_p10 = scmp.lt.u32.totalorder %s1864_s28, %s1860_s13  ;;  %p1868_p12 = scmp.lt.u32.totalorder %s1860_s13, %s2376_s15 }
 0x4e5   : > { %p1862_p7 = pnand %p1861_p4, %p1988_p5 }
 0x4e6   : > { %p1867_p11 = por %p1866_p10, %p1865_p9 }
 0x4e7   : > { %p1863_p8 = pneg %p1862_p7 }
 0x4e8   : > { %p1869_p13 = por %p1868_p12, %p1867_p11 }
 0x4ea   : > { %p1870_p0 = pnand %p1869_p13, %p1863_p8 }
 0x4ec   : > { %1873 = shalt.err (!%p1870_p0)
}
 0x4ed   : > { %1791 = dma.vmem_to_hbm [thread:$0]  (%p1988_p5), %s2378_s11, 16, %s2376_s15, %s1105_s16  }
 0x4ee PF: > { %p1797_p1 = scmp.ge.s32.totalorder %s1908_s24, 2  ;;  %s1129_s10 = sand.u32 1, %s1896_s21  }
 0x4ef   : > { %s1130_s12 = scalar_lea.sflag [#allocation3], %s1129_s10 }
 0x4f0   : > { %p1794_p2 = pnand %p1797_p1, %p1992_p6 }
 0x4f2   : > { %1891 = dma.done.wait (!%p1794_p2), %s1130_s12, 16  }
 0x4f3   : > { %1893 = vsyncadd (!%p1794_p2), %s1130_s12, 4294967280  ;;  %p16_p3 = scmp.ge.s32.totalorder %s1975_s27, 4   ;;  %s2427_s21 = smov %s1900_s22 }
 0x4f4   : > { %s2428_s22 = smov %s1904_s23  ;;  %s2429_s23 = smov %s1986_s30 }
 0x4f5   : > { %s2430_s24 = smov %s1975_s27  ;;  %18 = sbr.rel (!%p16_p3) target bundleno = 3 (0x3), region = 89 }
 0x4fc   :  { %1134 = vsyncpa [#allocation3], 1 }
 0x4fd   :  { %1136 = vsyncpa [#allocation3 + $0x1], 1 }

</bundles_post_ra>
